<compile_context>
chip_gen: v6e
topology: v6e:2x2x1
jax: 0.10.0
libtpu: 0.0.40
codegen_flags: <defaults>
</compile_context>

<pallas_src>
import functools

import jax
import jax.numpy as jnp
from jax.experimental import pallas as pl
from jax.experimental.pallas import tpu as pltpu

_LANE = 128


# ----------------------------------------------------------------------------
# Pallas kernel: one spatial tile = one deep matmul + bias + activation
# ----------------------------------------------------------------------------
def _conv_mm_kernel(x_ref, w_ref, b_ref, o_ref, *, activation):
    # x_ref: (1, KKCp, TM) bf16  im2col patch columns (lane dim = spatial)
    # w_ref: (Cout, KKCp)  bf16  folded conv weights
    # b_ref: (Cout, 1)     f32   bias (zeros when use_bias=False)
    # o_ref: (1, Cout, TM)       output tile (lane-dense, no channel padding)
    y = jnp.dot(w_ref[...], x_ref[0], preferred_element_type=jnp.float32)
    y = y + b_ref[...]                       # lane-broadcast of (Cout, 1)
    if activation == "relu":
        y = jnp.maximum(y, 0.0)
    elif activation == "leaky_relu":
        y = jnp.where(y >= 0.0, y, 0.2 * y)
    elif activation == "sigmoid":
        y = jax.nn.sigmoid(y)
    elif activation == "tanh":
        y = jnp.tanh(y)
    # 'none' -> identity
    o_ref[0] = y.astype(o_ref.dtype)


# ----------------------------------------------------------------------------
# Generation-aware tiling helpers
# ----------------------------------------------------------------------------
def _vmem_capacity_bytes():
    try:
        info = pltpu.get_tpu_info()
        cap = int(getattr(info, "vmem_capacity_bytes", 0) or 0)
        if cap > 0:
            return cap
    except Exception:
        pass
    return 64 * 1024 * 1024  # conservative fallback (v7x per-TensorCore VMEM)


def _choose_tile_m(m, n_batch, kkc, cout, out_itemsize, vmem_phys):
    """Spatial (lane-dim) tile: multiple of 128, VMEM-budgeted, >= ~8 steps."""
    budget = max(8 << 20, int(vmem_phys * 0.4))
    # double-buffered input + output blocks + headroom for f32 intermediates
    per_col = 2 * (2 * kkc) + 2 * (cout * out_itemsize) + 4 * cout * 4
    tm = budget // per_col
    tm = min(tm, 32768, pl.cdiv(m, _LANE) * _LANE)
    tm = max(_LANE, (tm // _LANE) * _LANE)
    # keep at least ~8 grid steps (pipelining + v7x 2-TensorCore occupancy)
    tm_occ = max(_LANE, ((n_batch * m) // 8 // _LANE) * _LANE)
    tm = min(tm, tm_occ)
    # prefer a tile that divides Ho*Wo exactly -> crop-free output reshape
    if m % _LANE == 0:
        while m % tm != 0:
            tm -= _LANE
    return tm


# ----------------------------------------------------------------------------
# Wrapper: NCHW in / NCHW out, matching FixupConvModule.forward semantics
# ----------------------------------------------------------------------------
def fixup_conv_module(x_nchw, weight_oihw, bias=None, *, ksize=3, stride=1,
                      pad=True, padding_mode="reflect", activation="none",
                      norm_layer="none"):
    # TODO(synk): norm_layer='batch'/'instance' and sn=True (spectral norm)
    # are not implemented (module defaults are norm_layer='none', sn=False).
    assert norm_layer == "none", "norm layers not implemented"

    N, Cin, H, W = x_nchw.shape
    Cout, Cin_w, KH, KW = weight_oihw.shape
    assert Cin_w == Cin and KH == KW == ksize
    K, s = ksize, stride
    p = (K - 1) // 2 if pad else 0
    Ho = (H + 2 * p - K) // s + 1
    Wo = (W + 2 * p - K) // s + 1
    assert Ho > 0 and Wo > 0

    out_dtype = x_nchw.dtype
    out_itemsize = jnp.dtype(out_dtype).itemsize

    # --- padding (no gather): jnp.pad on NCHW; bf16 for the MXU -------------
    xp = x_nchw.astype(jnp.bfloat16)
    if p > 0:
        mode = {"reflect": "reflect", "replicate": "edge",
                "circular": "wrap", "zeros": "constant"}[padding_mode]
        xp = jnp.pad(xp, ((0, 0), (0, 0), (p, p), (p, p)), mode=mode)

    # --- full K*K im2col in the wrapper, channel-major layout ----------------
    # patches[n, (ky*K+kx)*Cin + c, i*Wo + j] = xp[n, c, i*s + ky, j*s + kx]
    slabs = [xp[:, :, ky: ky + s * (Ho - 1) + 1: s, kx: kx + s * (Wo - 1) + 1: s]
             for ky in range(K) for kx in range(K)]
    KKC = K * K * Cin
    KKCp = -(-KKC // 8) * 8              # sublane-align the contraction dim
    if KKCp != KKC:
        slabs.append(jnp.zeros((N, KKCp - KKC, Ho, Wo), jnp.bfloat16))
    patches = jnp.concatenate(slabs, axis=1).reshape(N, KKCp, Ho * Wo)

    # --- weights / bias in the matching folded layout ------------------------
    w2 = jnp.transpose(weight_oihw, (0, 2, 3, 1)).reshape(Cout, KKC)
    w2 = jnp.pad(w2, ((0, 0), (0, KKCp - KKC))).astype(jnp.bfloat16)
    if bias is None:
        b2 = jnp.zeros((Cout, 1), jnp.float32)
    else:
        b2 = bias.astype(jnp.float32).reshape(Cout, 1)

    # --- spatial tiling (lane dim), generation-aware VMEM budget ------------
    M = Ho * Wo
    vmem_phys = _vmem_capacity_bytes()
    TM = _choose_tile_m(M, N, KKCp, Cout, out_itemsize, vmem_phys)
    Mp = pl.cdiv(M, TM) * TM
    if Mp != M:
        patches = jnp.pad(patches, ((0, 0), (0, 0), (0, Mp - M)))

    in_blk = KKCp * TM * 2
    out_blk = Cout * TM * out_itemsize
    w_bytes = Cout * KKCp * 2
    need = 2 * in_blk + 2 * out_blk + w_bytes + 6 * Cout * TM * 4 + (2 << 20)
    vmem_limit = int(min(vmem_phys * 3 // 4, max(32 << 20, need)))

    cost = pl.CostEstimate(
        flops=2 * N * M * KKC * Cout,
        transcendentals=(N * M * Cout if activation in ("sigmoid", "tanh") else 0),
        bytes_accessed=int(patches.size * 2 + w2.size * 2
                           + N * Cout * Mp * out_itemsize),
    )

    kernel = functools.partial(_conv_mm_kernel, activation=activation)

    out = pl.pallas_call(
        kernel,
        out_shape=jax.ShapeDtypeStruct((N, Cout, Mp), out_dtype),
        grid_spec=pltpu.PrefetchScalarGridSpec(
            num_scalar_prefetch=0,
            grid=(N, Mp // TM),
            in_specs=[
                pl.BlockSpec((1, KKCp, TM), lambda n, m: (n, 0, m)),
                pl.BlockSpec((Cout, KKCp), lambda n, m: (0, 0)),
                pl.BlockSpec((Cout, 1), lambda n, m: (0, 0)),
            ],
            out_specs=pl.BlockSpec((1, Cout, TM), lambda n, m: (n, 0, m)),
        ),
        compiler_params=pltpu.CompilerParams(
            dimension_semantics=("parallel", "parallel"),
            vmem_limit_bytes=vmem_limit,
        ),
        cost_estimate=cost,
    )(patches, w2, b2)

    if Mp != M:
        out = out[:, :, :M]
    return out.reshape(N, Cout, Ho, Wo)


# ----------------------------------------------------------------------------
# Deterministic parameter init: xavier_uniform with gain for the activation
# (matches _init_fc_or_conv; bias is None since use_bias=False by default)
# ----------------------------------------------------------------------------
def init_fixup_conv_weight(key, n_in, n_out, ksize, activation="none"):
    gain = 1.0
    if activation == "relu":
        gain = float(jnp.sqrt(2.0))
    elif activation == "leaky_relu":
        gain = float(jnp.sqrt(2.0 / (1.0 + 0.2 ** 2)))
    elif activation == "tanh":
        gain = 5.0 / 3.0
    fan_in = n_in * ksize * ksize
    fan_out = n_out * ksize * ksize
    bound = gain * float(jnp.sqrt(6.0 / (fan_in + fan_out)))
    # OIHW, same layout as nn.Conv2d.weight
    return jax.random.uniform(
        key, (n_out, n_in, ksize, ksize), jnp.float32, -bound, bound
    )


if __name__ == "__main__":
    key = jax.random.PRNGKey(0)
    k_x, k_w = jax.random.split(key)

    N, Cin, Cout, H, W, K = 2, 4, 8, 16, 16, 3
    activation = "none"  # module default

    x = jax.random.normal(k_x, (N, Cin, H, W), jnp.float32)
    w = init_fixup_conv_weight(k_w, Cin, Cout, K, activation)

    conv = jax.jit(functools.partial(fixup_conv_module, ksize=K,
                                     activation=activation))
    out = jax.block_until_ready(conv(x, w))
    assert out.shape == (N, Cout, H, W)

    # Self-check: XLA conv on the same bf16-cast, reflect-padded input.
    xp_ref = jnp.pad(x.astype(jnp.bfloat16), ((0, 0), (0, 0), (1, 1), (1, 1)),
                     mode="reflect")
    ref = jax.lax.conv_general_dilated(
        xp_ref, w.astype(jnp.bfloat16), window_strides=(1, 1), padding="VALID",
        dimension_numbers=("NCHW", "OIHW", "NCHW"),
        preferred_element_type=jnp.float32)

    assert jnp.allclose(out, ref, atol=1e-2, rtol=1e-2), \
        float(jnp.max(jnp.abs(out - ref)))

    print("KERNEL_OK")
</pallas_src>

<mosaic_0001>
module attributes {stable_mosaic.version = 11 : i64} {
  func.func @_conv_mm_kernel(%arg0: i32, %arg1: i32, %arg2: memref<1x40x128xbf16, #tpu.memory_space<vmem>>, %arg3: memref<8x40xbf16, #tpu.memory_space<vmem>>, %arg4: memref<8x1xf32, #tpu.memory_space<vmem>>, %arg5: memref<1x8x128xf32, #tpu.memory_space<vmem>>) attributes {dimension_semantics = [#tpu.dimension_semantics<parallel>, #tpu.dimension_semantics<parallel>], iteration_bounds = array<i64: 2, 2>, scalar_prefetch = 0 : i64, scratch_operands = 0 : i64, tpu.core_type = #tpu.core_type<tc>, window_params = [{transform_indices = @transform_0, window_bounds = array<i64: 1, 40, 128>}, {pipeline_mode = #tpu.pipeline_mode<synchronous>, transform_indices = @transform_1, window_bounds = array<i64: 8, 40>}, {pipeline_mode = #tpu.pipeline_mode<synchronous>, transform_indices = @transform_2, window_bounds = array<i64: 8, 1>}, {transform_indices = @transform_3, window_bounds = array<i64: 1, 8, 128>}]} {
    %c0 = arith.constant 0 : index
    %c0_0 = arith.constant 0 : index
    %0 = vector.load %arg3[%c0, %c0_0] : memref<8x40xbf16, #tpu.memory_space<vmem>>, vector<8x40xbf16>
    %c0_1 = arith.constant 0 : index
    %c0_2 = arith.constant 0 : index
    %c0_3 = arith.constant 0 : index
    %1 = vector.load %arg2[%c0_1, %c0_2, %c0_3] : memref<1x40x128xbf16, #tpu.memory_space<vmem>>, vector<1x40x128xbf16>
    %2 = vector.shape_cast %1 : vector<1x40x128xbf16> to vector<40x128xbf16>
    %cst = arith.constant dense<0.000000e+00> : vector<8x128xf32>
    %3 = tpu.matmul %0, %2, %cst {dimension_numbers = #tpu.dot_dimension_numbers<[1], [0], [0], [1], [0, 0, 1, 1], [], []>} : vector<8x40xbf16>, vector<40x128xbf16>, vector<8x128xf32> -> vector<8x128xf32>
    %c0_4 = arith.constant 0 : index
    %c0_5 = arith.constant 0 : index
    %4 = vector.load %arg4[%c0_4, %c0_5] : memref<8x1xf32, #tpu.memory_space<vmem>>, vector<8x1xf32>
    %5 = vector.broadcast %4 : vector<8x1xf32> to vector<8x128xf32>
    %6 = arith.addf %3, %5 : vector<8x128xf32>
    %c0_6 = arith.constant 0 : index
    %c0_7 = arith.constant 0 : index
    %c0_8 = arith.constant 0 : index
    %7 = vector.load %arg5[%c0_6, %c0_7, %c0_8] : memref<1x8x128xf32, #tpu.memory_space<vmem>>, vector<1x8x128xf32>
    %8 = vector.shape_cast %7 : vector<1x8x128xf32> to vector<8x128xf32>
    %9 = vector.shape_cast %6 : vector<8x128xf32> to vector<1x8x128xf32>
    tpu.vector_store %arg5[%c0_6, %c0_7, %c0_8], %9 {strides = array<i32>} : memref<1x8x128xf32, #tpu.memory_space<vmem>>, vector<1x8x128xf32>,
    return
  }
  func.func @transform_0(%arg0: i32, %arg1: i32) -> (i32, i32, i32) {
    %c0_i32 = arith.constant 0 : i32
    %c0_i32_0 = arith.constant 0 : i32
    return %arg0, %c0_i32, %arg1 : i32, i32, i32
  }
  func.func @transform_1(%arg0: i32, %arg1: i32) -> (i32, i32) {
    %c0_i32 = arith.constant 0 : i32
    %c0_i32_0 = arith.constant 0 : i32
    %c0_i32_1 = arith.constant 0 : i32
    return %c0_i32, %c0_i32_0 : i32, i32
  }
  func.func @transform_2(%arg0: i32, %arg1: i32) -> (i32, i32) {
    %c0_i32 = arith.constant 0 : i32
    %c0_i32_0 = arith.constant 0 : i32
    %c0_i32_1 = arith.constant 0 : i32
    return %c0_i32, %c0_i32_0 : i32, i32
  }
  func.func @transform_3(%arg0: i32, %arg1: i32) -> (i32, i32, i32) {
    %c0_i32 = arith.constant 0 : i32
    %c0_i32_0 = arith.constant 0 : i32
    return %arg0, %c0_i32, %arg1 : i32, i32, i32
  }
}

</mosaic_0001>

<bundles_post_ra>
// kernel: fixup_conv_module.1
= control target key start
LH: loop header
LB: loop body
LE: loop exit
PB: predicated region body
PF: predicated region fallthrough
CT: control target
= control target key end

     0   :  { %s592_s12 = smov 0   ;;  %s594_s13 = smov 0   ;;  %s689_s0 = inlined_call_operand.vmem [shape: bf16[2,40,256], index: 0, kind: input, shape index: {}]   ;;  %s690_s1 = inlined_call_operand.vmem [shape: bf16[8,40], index: 1, kind: input, shape index: {}]   ;;  %s691_s2 = inlined_call_operand.vmem [shape: f32[8,1], index: 2, kind: input, shape index: {}]   ;;  %s692_s3 = inlined_call_operand.vmem [shape: f32[2,8,256], index: 3, kind: output, shape index: {}]  }
   0x1   :  { %s596_s14 = smov 0   ;;  %s598_s15 = smov 0  }
   0x2   :  { %s600_s16 = smov 0   ;;  %s602_s17 = smov 0  }
   0x3   :  { %s604_s18 = smov 0  }
   0x4 LB: > { %s22_s19 = sadd.s32 1, %s559_s16  ;;  %s25_s20 = sadd.s32 1, %s563_s17  ;;  %s567_s18 = sphi %s604_s18, %s13_s18   ;;  %s563_s17 = sphi %s602_s17, %s698_s17   ;;  %s559_s16 = sphi %s600_s16, %s697_s16   ;;  %s555_s15 = sphi %s598_s15, %s696_s15   ;;  %s551_s14 = sphi %s596_s14, %s695_s14   ;;  %s547_s13 = sphi %s594_s13, %s694_s13   ;;  %s543_s12 = sphi %s592_s12, %s693_s12  }
   0x5   : > { %p23_p0 = scmp.ge.s32.totalorder %s22_s19, 2  ;;  %p41_p1 = scmp.ne.s32.totalorder %s547_s13, %s543_s12 }
   0x6   : > { %p42_p2 = scmp.eq.s32.totalorder %s567_s18, 0  ;;  %s34_s24 = sadd.s32 1, %s547_s13 }
   0x7   : > { %s700_s19 = smov (%p23_p0, %s22_s19), 0  ;;  %s702_s20 = smov (!%p23_p0, %s25_s20), %s563_s17 }
   0x8   : > { %p43_p3 = por %p42_p2, %p41_p1  ;;  %p27_p4 = scmp.ge.s32.totalorder %s702_s20, 2 }
   0x9   : > { %s30_s21 = ssub.s32 %s559_s16, %s700_s19  ;;  %p422_p6 = scmp.ge.s32.totalorder %s567_s18, 4 }
   0xa   : > { %s704_s20 = smov (%p27_p4, %s702_s20), 0 }
   0xb   : > { %s29_s22 = ssub.s32 %s563_s17, %s704_s20  ;;  %143 = sbr.rel (%p422_p6) target bundleno = 26 (0x1a), region = 24 }
   0xc   : > { %s31_s23 = sor.u32 %s30_s21, %s29_s22 }
   0xd   : > { %p32_p5 = scmp.eq.s32.totalorder %s31_s23, 0 }
   0xf   : > { %s643_s25 = scalar_select %p32_p5, %s547_s13, %s34_s24  }
  0x10   : > { %146 = sbr.rel (!%p43_p3) target bundleno = 26 (0x1a), region = 28  ;;  %s148_s26 = sand.u32 (%p43_p3), 1, %s547_s13  }
  0x11   : > { %s448_s27 = smul.u32 (%p43_p3), 10, %s563_s17 }
  0x12   : > { %s447_s28 = smul.u32 (%p43_p3), 20, %s148_s26 }
  0x13   : > { %s152_s29 = sadd.s32 (%p43_p3), %s559_s16, %s448_s27 }
  0x14   : > { %s423_s30 = sshll.u32 (%p43_p3), %s152_s29, 2  ;;  %s150_s7 = scalar_lea.vmem (%p43_p3), [#allocation2], %s447_s28 }
  0x15   : > { %s154_s6 = scalar_lea.vmem %s689_s0, %s423_s30 }
  0x16   : > { %v171_v0 = vld [vmem:[%s154_s6] sm:$0xf]  ;;  %v173_v1 = vld [vmem:[%s154_s6 + $0x8] sm:$0xf]  ;;  %v175_v2 = vld [vmem:[%s154_s6 + $0x10] sm:$0xf] }
  0x17   : > { %172 = vst [vmem:[%s150_s7] sm:$0xf] %v171_v0  ;;  %174 = vst [vmem:[%s150_s7 + $0x4] sm:$0xf] %v173_v1  ;;  %v177_v3 = vld [vmem:[%s154_s6 + $0x18] sm:$0xf] }
  0x18   : > { %176 = vst [vmem:[%s150_s7 + $0x8] sm:$0xf] %v175_v2  ;;  %v179_v4 = vld [vmem:[%s154_s6 + $0x20] sm:$0xf]  ;;  %178 = vst [vmem:[%s150_s7 + $0xc] sm:$0xf] %v177_v3 }
  0x19   : > { %180 = vst [vmem:[%s150_s7 + $0x10] sm:$0xf] %v179_v4 }
  0x1a PF: > { %p424_p7 = scmp.ge.s32.totalorder %s567_s18, 1  ;;  %p213_p8 = scmp.lt.s32.totalorder %s567_s18, 5 }
  0x1c   : > { %p214_p9 = pnand %p424_p7, %p213_p8 }
  0x1d   : > { %s220_s8 = sand.u32 (!%p214_p9), 1, %s543_s12   ;;  %p246_p10 = scmp.lt.s32.totalorder (!%p214_p9), %s555_s15, 1 }
  0x1e   : > { %217 = sbr.rel (%p214_p9) target bundleno = 248 (0xf8), region = 69  ;;  %p248_p11 = scmp.lt.s32.totalorder (!%p214_p9), %s551_s14, 1 }
  0x1f   : > { %s449_s9 = smul.u32 (!%p214_p9), 20, %s220_s8 }
  0x21   : > { %s222_s21 = scalar_lea.vmem (!%p214_p9), [#allocation2], %s449_s9 }
  0x23   : > { %v569_v5 = vmov 0.0   ;;  %vm570_vm0 = vmmov 0   ;;  %v261_v6 = vld [vmem:[%s691_s2] sm:$0xff]  ;;  %v571_v7 = vmov 0   ;;  %vm286_vm1 = vcmask 1043456   ;;  %s706_s15 = smov (!%p246_p10, %s555_s15), 1 }
  0x24   : > { %437 = vmatprep.subr.bf16.mxu0 %v569_v5  ;;  %443 = vmatprep.mubr.msk.bf16.mxu0 %vm570_vm0, %v569_v5  ;;  %v510_v8 = vld [vmem:[%s222_s21 + $0x10] ss:$0 sps:$4 sm:$0xff]   ;;  %v511_v10 = vld [vmem:[%s222_s21 + $0x8] sm:$0xff]   ;;  %v512_v11 = vld [vmem:[%s222_s21] sm:$0xff]   ;;  %vm282_vm2 = vcmask 326656   ;;  %s708_s14 = smov (!%p248_p11, %s551_s14), 1 }
  0x25   : > { %509 = vset.pattern.permute.xlu0 %v571_v7  ;;  %v288_v9 = vsel %vm286_vm1, %v510_v8, 0  ;;  %v255_v12 = vld [vmem:[%s690_s1] sm:$0xf]  ;;  %s425_s23 = sshll.u32 %s706_s15, 1 }
  0x26   : > { %264 = vperm.xlu0 %509, %v261_v6   ;;  %438 = vmatpush3.bf16.msra.mxu0 %v288_v9  ;;  %s251_s24 = sadd.s32 %s425_s23, %s708_s14 }
  0x27   : > { %439 = vmatprep.subr.bf16.mxu0 %v569_v5  ;;  %s426_s26 = sshll.u32 %s251_s24, 3 }
  0x28   : > { %s253_s29 = scalar_lea.vmem %s692_s3, %s426_s26 }
  0x2a   : > { %440 = vmatpush3.bf16.msra.mxu0 %v511_v10 }
  0x2b   : > { %441 = vmatprep.subr.bf16.mxu0 %v569_v5 }
  0x2e   : > { %442 = vmatpush3.bf16.msra.mxu0 %v512_v11 }
  0x31   : > { %444 = vmatmul.mubr.msk.bf16.vlgmr.msra.gmra.mxu0 %vm282_vm2, %v255_v12 }
  0xa1   : > { %v265_v13 = vpop.permute.xlu0 %264 }
  0xf1   : > { %v324_v14 = vpop.f32.mrf.mxu0 }
  0xf2   : > { %v325_v15 = vadd.f32 %v324_v14, %v265_v13 }
  0xf3   : > { %v445_v16 = vpop.f32.mrf.mxu0 }
  0xf4   : > { %330 = vst [vmem:[%s253_s29] sm:$0xff] %v325_v15 }
  0xf5   : > { %v327_v17 = vpop.f32.mrf.mxu0 }
  0xf7   : > { %v446_v18 = vpop.f32.mrf.mxu0 }
  0xf8 PF: > { %s13_s18 = sadd.s32 1, %s567_s18   ;;  %s693_s12 = smov %s547_s13 }
  0xf9   : > { %p10_p12 = scmp.ge.s32.totalorder %s13_s18, 6   ;;  %s694_s13 = smov %s643_s25 }
  0xfa   : > { %s695_s14 = smov %s559_s16  ;;  %s696_s15 = smov %s563_s17 }
  0xfb   : > { %s697_s16 = smov %s700_s19  ;;  %s698_s17 = smov %s704_s20 }
  0xfc   :  { %12 = sbr.rel (!%p10_p12) target bundleno = 4 (0x4), region = 108 }

</bundles_post_ra>
